<compile_context>
chip_gen: v6e
topology: v6e:2x2x1
jax: 0.10.0
libtpu: 0.0.40
codegen_flags: <defaults>
</compile_context>

<pallas_src>
import functools

import jax
import jax.numpy as jnp
from jax.experimental import pallas as pl
from jax.experimental.pallas import tpu as pltpu


def _contrastive_loss_kernel(o1_ref, o2_ref, lab_ref, out_ref, *,
                             margin, batch, tile_b, need_mask):
    # Cast in-vreg (cheap VPU op); accumulate in f32 regardless of input dtype.
    o1 = o1_ref[...].astype(jnp.float32)                          # (TB, D)
    o2 = o2_ref[...].astype(jnp.float32)                          # (TB, D)
    diff = o1 - o2
    sq_dist = jnp.sum(diff * diff, axis=1, keepdims=True) + 1e-10  # (TB, 1) == d^2
    d = jnp.sqrt(sq_dist)                                           # (TB, 1)

    lab = lab_ref[...].astype(jnp.float32)                         # (TB, 1)
    loss_pos = lab * sq_dist                                        # label * d^2
    hinge = jnp.maximum(margin - d, 0.0)
    loss_neg = (1.0 - lab) * (hinge * hinge)
    per_row = loss_pos + loss_neg                                   # (TB, 1)

    if need_mask:
        base = pl.program_id(0) * tile_b
        rows = jax.lax.broadcasted_iota(jnp.int32, per_row.shape, 0) + base
        per_row = jnp.where(rows < batch, per_row, 0.0)

    tile_sum = jnp.sum(per_row)                                     # scalar partial
    # Lane-dense (1,1,128) per-tile partial-sum block; final reduction outside.
    out_ref[...] = jnp.full(out_ref.shape, tile_sum, dtype=out_ref.dtype)


def _pick_tile_b(batch, feat, itemsize):
    """Largest batch tile whose double-buffered feature inputs fit ~16 MiB."""
    budget = 16 * 1024 * 1024
    per_row = 2 * 2 * feat * itemsize          # 2 inputs x 2 pipeline buffers
    tb = budget // max(per_row, 1)
    tb = max(8, min(int(tb), 1024))
    tb = (tb // 8) * 8                         # keep sublane count (8,128)-legal
    if tb >= batch:
        return batch                           # single tile: block == full array dim
    return tb


def contrastive_loss(output1, output2, label, margin=1.0):
    """output1, output2: (B, D); label: (B,). Returns scalar float32 loss."""
    B, D = output1.shape
    itemsize = jnp.dtype(output1.dtype).itemsize
    TB = _pick_tile_b(B, D, itemsize)
    num_tiles = pl.cdiv(B, TB)
    need_mask = (B % TB) != 0

    # Label is tiny; reshape to (B, 1) so it co-tiles with the feature blocks.
    label2d = label.reshape(B, 1).astype(jnp.float32)

    kernel = functools.partial(
        _contrastive_loss_kernel,
        margin=float(margin), batch=B, tile_b=TB, need_mask=need_mask,
    )

    partials = pl.pallas_call(
        kernel,
        out_shape=jax.ShapeDtypeStruct((num_tiles, 1, 128), jnp.float32),
        grid_spec=pltpu.PrefetchScalarGridSpec(
            num_scalar_prefetch=0,
            grid=(num_tiles,),
            in_specs=[
                pl.BlockSpec((TB, D), lambda i: (i, 0)),   # output1 tile
                pl.BlockSpec((TB, D), lambda i: (i, 0)),   # output2 tile
                pl.BlockSpec((TB, 1), lambda i: (i, 0)),   # label column tile
            ],
            out_specs=pl.BlockSpec((1, 1, 128), lambda i: (i, 0, 0)),
        ),
        compiler_params=pltpu.CompilerParams(
            # Each grid step writes its own output block -> safe to shard across
            # TensorCores on v7x; neutral on v5e/v6e.
            dimension_semantics=("parallel",),
            vmem_limit_bytes=32 * 1024 * 1024,
        ),
    )(output1, output2, label2d)

    # Final tiny reduction + mean(...) / 2 folded into a single multiply (1/(2B)).
    return jnp.sum(partials[:, 0, 0]) * (1.0 / (2.0 * B))


def contrastive_loss_ref(output1, output2, label, margin=1.0):
    o1 = output1.astype(jnp.float32)
    o2 = output2.astype(jnp.float32)
    d = jnp.sqrt(jnp.sum((o1 - o2) ** 2, axis=1) + 1e-10)
    lp = label * d**2
    ln = (1.0 - label) * jnp.square(jnp.maximum(margin - d, 0.0))
    return jnp.mean(lp + ln) / 2.0


if __name__ == "__main__":
    key = jax.random.PRNGKey(0)
    k1, k2, k3 = jax.random.split(key, 3)

    B, D = 8, 32  # small shapes consistent with the module: batch=8, hidden=32
    output1 = jax.random.normal(k1, (B, D), dtype=jnp.float32)
    output2 = jax.random.normal(k2, (B, D), dtype=jnp.float32)
    label = jax.random.bernoulli(k3, 0.5, (B,)).astype(jnp.float32)

    loss = contrastive_loss(output1, output2, label, margin=1.0)
    jax.block_until_ready(loss)

    ref = contrastive_loss_ref(output1, output2, label, margin=1.0)
    assert jnp.allclose(loss, ref, rtol=1e-5, atol=1e-6), (loss, ref)

    print("KERNEL_OK")
</pallas_src>

<mosaic_0001>
module attributes {stable_mosaic.version = 11 : i64} {
  func.func @_contrastive_loss_kernel(%arg0: i32, %arg1: memref<8x32xf32, #tpu.memory_space<vmem>>, %arg2: memref<8x32xf32, #tpu.memory_space<vmem>>, %arg3: memref<8x1xf32, #tpu.memory_space<vmem>>, %arg4: memref<1x1x128xf32, #tpu.memory_space<vmem>>) attributes {dimension_semantics = [#tpu.dimension_semantics<parallel>], iteration_bounds = array<i64: 1>, scalar_prefetch = 0 : i64, scratch_operands = 0 : i64, tpu.core_type = #tpu.core_type<tc>, window_params = [{transform_indices = @transform_0, window_bounds = array<i64: 8, 32>}, {transform_indices = @transform_1, window_bounds = array<i64: 8, 32>}, {transform_indices = @transform_2, window_bounds = array<i64: 8, 1>}, {transform_indices = @transform_3, window_bounds = array<i64: 1, 1, 128>}]} {
    %c0 = arith.constant 0 : index
    %c0_0 = arith.constant 0 : index
    %0 = vector.load %arg1[%c0, %c0_0] : memref<8x32xf32, #tpu.memory_space<vmem>>, vector<8x32xf32>
    %c0_1 = arith.constant 0 : index
    %c0_2 = arith.constant 0 : index
    %1 = vector.load %arg2[%c0_1, %c0_2] : memref<8x32xf32, #tpu.memory_space<vmem>>, vector<8x32xf32>
    %2 = arith.subf %0, %1 : vector<8x32xf32>
    %3 = arith.mulf %2, %2 : vector<8x32xf32>
    %cst = arith.constant dense<0.000000e+00> : vector<8xf32>
    %4 = vector.multi_reduction <add>, %3, %cst [1] : vector<8x32xf32> to vector<8xf32>
    %5 = vector.shape_cast %4 : vector<8xf32> to vector<8x1xf32>
    %cst_3 = arith.constant 1.000000e-10 : f32
    %6 = vector.broadcast %cst_3 : f32 to vector<8x1xf32>
    %7 = arith.addf %5, %6 : vector<8x1xf32>
    %8 = math.sqrt %7 : vector<8x1xf32>
    %c0_4 = arith.constant 0 : index
    %c0_5 = arith.constant 0 : index
    %9 = vector.load %arg3[%c0_4, %c0_5] : memref<8x1xf32, #tpu.memory_space<vmem>>, vector<8x1xf32>
    %10 = arith.mulf %9, %7 : vector<8x1xf32>
    %cst_6 = arith.constant 1.000000e+00 : f32
    %11 = vector.broadcast %cst_6 : f32 to vector<8x1xf32>
    %12 = arith.subf %11, %8 : vector<8x1xf32>
    %cst_7 = arith.constant 0.000000e+00 : f32
    %13 = vector.broadcast %cst_7 : f32 to vector<8x1xf32>
    %14 = arith.maximumf %12, %13 : vector<8x1xf32>
    %cst_8 = arith.constant 1.000000e+00 : f32
    %15 = vector.broadcast %cst_8 : f32 to vector<8x1xf32>
    %16 = arith.subf %15, %9 : vector<8x1xf32>
    %17 = arith.mulf %14, %14 : vector<8x1xf32>
    %18 = arith.mulf %16, %17 : vector<8x1xf32>
    %19 = arith.addf %10, %18 : vector<8x1xf32>
    %20 = vector.shape_cast %19 : vector<8x1xf32> to vector<1x8x1xf32>
    %cst_9 = arith.constant dense<0.000000e+00> : vector<1xf32>
    %21 = vector.multi_reduction <add>, %20, %cst_9 [1, 2] : vector<1x8x1xf32> to vector<1xf32>
    %22 = vector.shape_cast %21 : vector<1xf32> to vector<1x1x1xf32>
    %23 = vector.extract %22[0, 0, 0] : f32 from vector<1x1x1xf32>
    %24 = vector.broadcast %23 : f32 to vector<1x1x128xf32>
    %c0_10 = arith.constant 0 : index
    %c0_11 = arith.constant 0 : index
    %c0_12 = arith.constant 0 : index
    %25 = vector.load %arg4[%c0_10, %c0_11, %c0_12] : memref<1x1x128xf32, #tpu.memory_space<vmem>>, vector<1x1x128xf32>
    tpu.vector_store %arg4[%c0_10, %c0_11, %c0_12], %24 {strides = array<i32>} : memref<1x1x128xf32, #tpu.memory_space<vmem>>, vector<1x1x128xf32>,
    return
  }
  func.func @transform_0(%arg0: i32) -> (i32, i32) {
    %c0_i32 = arith.constant 0 : i32
    %c0_i32_0 = arith.constant 0 : i32
    return %arg0, %c0_i32 : i32, i32
  }
  func.func @transform_1(%arg0: i32) -> (i32, i32) {
    %c0_i32 = arith.constant 0 : i32
    %c0_i32_0 = arith.constant 0 : i32
    return %arg0, %c0_i32 : i32, i32
  }
  func.func @transform_2(%arg0: i32) -> (i32, i32) {
    %c0_i32 = arith.constant 0 : i32
    %c0_i32_0 = arith.constant 0 : i32
    return %arg0, %c0_i32 : i32, i32
  }
  func.func @transform_3(%arg0: i32) -> (i32, i32, i32) {
    %c0_i32 = arith.constant 0 : i32
    %c0_i32_0 = arith.constant 0 : i32
    %c0_i32_1 = arith.constant 0 : i32
    return %arg0, %c0_i32, %c0_i32_0 : i32, i32, i32
  }
}

</mosaic_0001>

<bundles_post_ra>
// kernel: tpu_custom_call.1
= control target key start
LH: loop header
LB: loop body
LE: loop exit
PB: predicated region body
PF: predicated region fallthrough
CT: control target
= control target key end

     0   :  { %8 = vsyncpa [#allocation3], 0  ;;  %s163_s0 = inlined_call_operand.vmem [shape: f32[8,32], index: 0, kind: input, shape index: {}]   ;;  %s164_s1 = inlined_call_operand.hbm [shape: f32[8,32], index: 1, kind: input, shape index: {}]   ;;  %s165_s2 = inlined_call_operand.vmem [shape: f32[8,1], index: 2, kind: input, shape index: {}]   ;;  %s166_s3 = inlined_call_operand.hbm [shape: f32[1,1,128], index: 3, kind: output, shape index: {}]  }
   0x1   :  { %9 = vsyncpa [#allocation4], 0  ;;  %s129_s12 = smov [#allocation2]  }
   0x2   :  { %s18_s13 = sshll.u32 %s129_s12, 4  ;;  %s19_s13 = int_to_ptr.vmem [resolvable:$true] %s18_s13 }
   0x3   :  { %s93_s14 = scalar_lea.vmem %s19_s13, 128  ;;  %p98_p1 = scmp.lt.s32.totalorder %s19_s13, %s19_s13 }
   0x4   :  { %p94_p0 = scmp.ne.s32.totalorder %s19_s13, %s93_s14  ;;  %p99_p2 = scmp.lt.s32.totalorder %s93_s14, %s93_s14 }
   0x6   :  { %p100_p3 = por %p99_p2, %p98_p1 }
   0x8   :  { %p101_p4 = pnand %p100_p3, %p94_p0 }
   0xa   :  { %104 = shalt.err (!%p101_p4)
}
   0xb   :  { %21 = dma.hbm_to_vmem [thread:$0]  %s164_s1, 128, %s19_s13, [#allocation3]  }
   0xc   :  { %125 = dma.done.wait [#allocation3], 128  }
   0xd   :  { %126 = vsyncadd [#allocation3], 4294967168  ;;  %v27_v0 = vld [vmem:[%s163_s0] sm:$0xff]  ;;  %vm31_vm0 = vcmask 261120   ;;  %vm51_vm3 = vcmask 7168   ;;  %s130_s0 = smov [#allocation5]  }
   0xe   :  { %v28_v1 = vld [vmem:[#allocation2] sm:$0xff]  ;;  %s70_s20 = sshll.u32 %s130_s0, 4  ;;  %s71_s20 = int_to_ptr.vmem [resolvable:$true] %s70_s20 }
   0xf   :  { %v29_v2 = vsub.f32 %v27_v0, %v28_v1  ;;  %v43_v13 = vld [vmem:[%s165_s2] sm:$0xff]  ;;  %s105_s21 = scalar_lea.vmem %s71_s20, 16  ;;  %s109_s22 = scalar_lea.vmem %s71_s20, 32 }
  0x10   :  { %v47_v15 = vsub.f32 1.0, %v43_v13  ;;  %p106_p5 = scmp.ne.s32.totalorder %s71_s20, %s105_s21  ;;  %p110_p6 = scmp.lt.s32.totalorder %s71_s20, %s71_s20 }
  0x11   :  { %v30_v3 = vmul.f32 %v29_v2, %v29_v2  ;;  %p111_p7 = scmp.lt.s32.totalorder %s109_s22, %s105_s21 }
  0x13   :  { %v32_v4 = vsel %vm31_vm0, %v30_v3, 0.0  ;;  %p112_p8 = por %p111_p7, %p110_p6 }
  0x14   :  { %33 = vadd.xlane.f32.xlu0 %v32_v4 }
  0x15   :  { %p113_p9 = pnand %p112_p8, %p106_p5 }
  0x9d   :  { %v34_v5 = vpop.xlane.xlu0 %33 }
  0x9e   :  { %v35_v6 = vadd.f32 1e-10, %v34_v5 }
  0xa0   :  { %83 = vrsqrt.f32 %v35_v6  ;;  %vm38_vm1 = vcmp.eq.f32.partialorder %v35_v6, inf  ;;  %v41_v9 = vand.u32 2147483648, %v35_v6  ;;  %vm40_vm2 = vcmp.eq.f32.partialorder %v35_v6, 0.0 }
  0xa1   :  { %v44_v17 = vmul.f32 %v43_v13, %v35_v6 }
  0xad   :  { %v84_v7 = vpop.eup %83 }
  0xae   :  { %v37_v8 = vmul.f32 %v84_v7, %v35_v6 }
  0xb0   :  { %v39_v10 = vsel %vm38_vm1, %v35_v6, %v37_v8 }
  0xb1   :  { %v42_v11 = vsel %vm40_vm2, %v41_v9, %v39_v10 }
  0xb2   :  { %v45_v12 = vsub.f32 1.0, %v42_v11 }
  0xb4   :  { %v46_v14 = vmax.f32 %v45_v12, 0.0 }
  0xb6   :  { %v48_v16 = vmul.f32 %v46_v14, %v46_v14 }
  0xb8   :  { %v49_v18 = vmul.f32 %v48_v16, %v47_v15 }
  0xba   :  { %v50_v19 = vadd.f32 %v49_v18, %v44_v17 }
  0xbc   :  { %v52_v20 = vsel %vm51_vm3, %v50_v19, 0.0 }
  0xbd   :  { %53 = vadd.xlane.f32.xlu0 %v52_v20 }
 0x146   :  { %v54_v21 = vpop.xlane.xlu0 %53 }
 0x147   :  { %v55_v22 = vrot.slane %v54_v21, 4 }
 0x149   :  { %v56_v23 = vadd.f32 %v55_v22, %v54_v21 }
 0x14b   :  { %v57_v24 = vrot.slane %v56_v23, 2 }
 0x14d   :  { %v58_v25 = vadd.f32 %v57_v24, %v56_v23 }
 0x14f   :  { %v59_v26 = vrot.slane %v58_v25, 1 }
 0x151   :  { %v60_v27 = vadd.f32 %v59_v26, %v58_v25 }
 0x153   :  { %79 = vpush %v60_v27 }
 0x184   :  { %s80_s2 = spop %79 }
 0x185   :  { %v62_v28 = vstv %s80_s2 }
 0x186   :  { %63 = vst [vmem:[#allocation5] sm:$0x1] %v62_v28 }
 0x187   :  { %116 = shalt.err (!%p113_p9)
}
 0x188   :  { %73 = dma.vmem_to_hbm [thread:$0]  %s71_s20, 16, %s166_s3, [#allocation4]  }
 0x189   :  { %127 = dma.done.wait [#allocation4], 16  }
 0x18a   :  { %128 = vsyncadd [#allocation4], 4294967280 }
 0x18b   :  { %77 = vsyncpa [#allocation3], 1 }
 0x18c   :  { %78 = vsyncpa [#allocation4], 1 }

</bundles_post_ra>
